<compile_context>
chip_gen: v7x
topology: tpu7x:2x2x1
jax: 0.10.0
libtpu: 0.0.40
codegen_flags: <defaults>
</compile_context>

<pallas_src>
import jax
import jax.numpy as jnp
from jax import lax
from jax.experimental import pallas as pl
from jax.experimental.pallas import tpu as pltpu


def _binary_dnn_kernel(x_ref,
                       w0_ref, b0_ref,
                       w1_ref, b1_ref,
                       w2_ref, b2_ref,
                       w3_ref, b3_ref,
                       o_ref):
    # x tile: (TB, num_ins) f32 from HBM; cast to bf16 on the VPU (hides under MXU).
    x = x_ref[...].astype(jnp.bfloat16)

    # Layer 0, feature-major: h_T = W0 @ x^T -> (d1, TB).
    # Contract the feature dims of W0 (d1, num_ins) and x (TB, num_ins) so the
    # batch lands on the MXU's lane/N axis (256-wide on v6e/v7x, 128 on v5e).
    h = lax.dot_general(w0_ref[...], x,
                        dimension_numbers=(((1,), (1,)), ((), ())),
                        preferred_element_type=jnp.float32)
    h = jnp.maximum(h + b0_ref[...], 0.0).astype(jnp.bfloat16)   # relu in f32, then pack

    # Layers 1-2: h_T = relu(W_i @ h_T + b_i), all (d_out, TB).
    h = jnp.dot(w1_ref[...], h, preferred_element_type=jnp.float32)
    h = jnp.maximum(h + b1_ref[...], 0.0).astype(jnp.bfloat16)

    h = jnp.dot(w2_ref[...], h, preferred_element_type=jnp.float32)
    h = jnp.maximum(h + b2_ref[...], 0.0).astype(jnp.bfloat16)

    # Layer 3 + final ReLU (matches the torch module) + exact sigmoid.
    h = jnp.dot(w3_ref[...], h, preferred_element_type=jnp.float32)
    h = jnp.maximum(h + b3_ref[...], 0.0)
    o_ref[...] = (1.0 / (1.0 + jnp.exp(-h))).astype(o_ref.dtype)  # lane-dense (num_outs, TB) store


def _round_up(n, m):
    return ((n + m - 1) // m) * m


def _pick_tile(B, tb):
    """Batch-tile size: 256-aligned (MXU-N friendly, also /128 for v5e) and at
    least 2 grid steps for large B so v7x megacore sharding kicks in."""
    if B <= 256:
        return B                       # single tile; block dims equal full extents
    tb = _round_up(max(tb, 256), 256)
    half = _round_up(pl.cdiv(B, 2), 256)
    return min(tb, half)


def _resident_spec(shape):
    """BlockSpec for an operand that stays fully VMEM-resident across the grid."""
    return pl.BlockSpec(shape, lambda i: (0, 0))


def binary_dnn_forward(x, params, *, tb=2048):
    """x: (B, num_ins) float32. params: torch-layout f32 weights (out, in) and
    biases (out, 1). Returns (B, num_outs) float32 probabilities."""
    B, num_ins = x.shape
    num_outs = params["w3"].shape[0]

    TB = _pick_tile(B, tb)
    grid = (pl.cdiv(B, TB),)

    # Weights feed the MXU in bf16 (tiny one-time cast); biases stay f32.
    w = [params[f"w{i}"].astype(jnp.bfloat16) for i in range(4)]
    b = [params[f"b{i}"] for i in range(4)]
    args = (x, w[0], b[0], w[1], b[1], w[2], b[2], w[3], b[3])

    in_specs = [pl.BlockSpec((TB, num_ins), lambda i: (i, 0))]     # batch-tiled x (f32)
    for wi, bi in zip(w, b):
        in_specs.append(_resident_spec(wi.shape))                  # weights: loaded once
        in_specs.append(_resident_spec(bi.shape))                  # biases:  loaded once

    out_specs = pl.BlockSpec((num_outs, TB), lambda i: (0, i))     # lane-dense output tile

    out_t = pl.pallas_call(
        _binary_dnn_kernel,
        out_shape=jax.ShapeDtypeStruct((num_outs, B), jnp.float32),
        grid=grid,
        in_specs=in_specs,
        out_specs=out_specs,
        compiler_params=pltpu.CompilerParams(
            dimension_semantics=("parallel",),
            vmem_limit_bytes=32 * 1024 * 1024,
        ),
    )(*args)

    return out_t.T                                                 # tiny (num_outs, B) -> (B, num_outs)


def init_binary_dnn_params(key, num_ins, num_outs):
    """Deterministic synthetic init matching BinaryDnn.__init__ layer shapes
    (torch-native (out, in) weight layout, U(-1/sqrt(in), 1/sqrt(in)))."""
    dim_1 = min(num_ins, 64)
    dim_2 = min(dim_1, 32)
    dim_3 = min(dim_2, 16)
    dims = [(num_ins, dim_1), (dim_1, dim_2), (dim_2, dim_3), (dim_3, num_outs)]

    params = {}
    for i, (d_in, d_out) in enumerate(dims):
        key, kw, kb = jax.random.split(key, 3)
        bound = 1.0 / (d_in ** 0.5)
        params[f"w{i}"] = jax.random.uniform(kw, (d_out, d_in), jnp.float32,
                                             minval=-bound, maxval=bound)
        params[f"b{i}"] = jax.random.uniform(kb, (d_out, 1), jnp.float32,
                                             minval=-bound, maxval=bound)
    return params


def binary_dnn_ref(x, params):
    """Pure-JAX reference of the torch forward pass with the same bf16
    quantization of x / weights / intermediate activations as the kernel."""
    h = x.astype(jnp.bfloat16).astype(jnp.float32)
    for i in range(4):
        w = params[f"w{i}"].astype(jnp.bfloat16).astype(jnp.float32)   # (out, in)
        bias = params[f"b{i}"][:, 0]                                   # (out,)
        h = jnp.maximum(h @ w.T + bias, 0.0)
        if i < 3:
            h = h.astype(jnp.bfloat16).astype(jnp.float32)
    return 1.0 / (1.0 + jnp.exp(-h))


if __name__ == "__main__":
    num_ins, num_outs = 32, 2
    key = jax.random.PRNGKey(0)
    key, kx = jax.random.split(key)
    params = init_binary_dnn_params(key, num_ins, num_outs)

    # Batches covering the single-tile path (128) and multi-grid-step / megacore
    # paths (512 -> TB=256, grid=2; 1024 -> TB=512, grid=2).
    for batch in (128, 512, 1024):
        x = jax.random.normal(jax.random.fold_in(kx, batch),
                              (batch, num_ins), jnp.float32)

        out = binary_dnn_forward(x, params)
        jax.block_until_ready(out)

        ref = binary_dnn_ref(x, params)
        assert out.shape == (batch, num_outs)
        assert jnp.allclose(out, ref, atol=2e-3, rtol=2e-3), \
            float(jnp.max(jnp.abs(out - ref)))

    print("KERNEL_OK")
</pallas_src>

<mosaic_0001>
module attributes {stable_mosaic.version = 11 : i64} {
  func.func @_binary_dnn_kernel(%arg0: i32, %arg1: memref<128x32xf32, #tpu.memory_space<vmem>>, %arg2: memref<32x32xbf16, #tpu.memory_space<vmem>>, %arg3: memref<32x1xf32, #tpu.memory_space<vmem>>, %arg4: memref<32x32xbf16, #tpu.memory_space<vmem>>, %arg5: memref<32x1xf32, #tpu.memory_space<vmem>>, %arg6: memref<16x32xbf16, #tpu.memory_space<vmem>>, %arg7: memref<16x1xf32, #tpu.memory_space<vmem>>, %arg8: memref<2x16xbf16, #tpu.memory_space<vmem>>, %arg9: memref<2x1xf32, #tpu.memory_space<vmem>>, %arg10: memref<2x128xf32, #tpu.memory_space<vmem>>) attributes {dimension_semantics = [#tpu.dimension_semantics<parallel>], iteration_bounds = array<i64: 1>, scalar_prefetch = 0 : i64, scratch_operands = 0 : i64, tpu.core_type = #tpu.core_type<tc>, window_params = [{transform_indices = @transform_0, window_bounds = array<i64: 128, 32>}, {pipeline_mode = #tpu.pipeline_mode<synchronous>, transform_indices = @transform_1, window_bounds = array<i64: 32, 32>}, {pipeline_mode = #tpu.pipeline_mode<synchronous>, transform_indices = @transform_2, window_bounds = array<i64: 32, 1>}, {pipeline_mode = #tpu.pipeline_mode<synchronous>, transform_indices = @transform_3, window_bounds = array<i64: 32, 32>}, {pipeline_mode = #tpu.pipeline_mode<synchronous>, transform_indices = @transform_4, window_bounds = array<i64: 32, 1>}, {pipeline_mode = #tpu.pipeline_mode<synchronous>, transform_indices = @transform_5, window_bounds = array<i64: 16, 32>}, {pipeline_mode = #tpu.pipeline_mode<synchronous>, transform_indices = @transform_6, window_bounds = array<i64: 16, 1>}, {pipeline_mode = #tpu.pipeline_mode<synchronous>, transform_indices = @transform_7, window_bounds = array<i64: 2, 16>}, {pipeline_mode = #tpu.pipeline_mode<synchronous>, transform_indices = @transform_8, window_bounds = array<i64: 2, 1>}, {transform_indices = @transform_9, window_bounds = array<i64: 2, 128>}]} {
    %c0 = arith.constant 0 : index
    %c0_0 = arith.constant 0 : index
    %0 = vector.load %arg1[%c0, %c0_0] : memref<128x32xf32, #tpu.memory_space<vmem>>, vector<128x32xf32>
    %1 = arith.truncf %0 : vector<128x32xf32> to vector<128x32xbf16>
    %c0_1 = arith.constant 0 : index
    %c0_2 = arith.constant 0 : index
    %2 = vector.load %arg2[%c0_1, %c0_2] : memref<32x32xbf16, #tpu.memory_space<vmem>>, vector<32x32xbf16>
    %cst = arith.constant dense<0.000000e+00> : vector<32x128xf32>
    %3 = tpu.matmul %2, %1, %cst {dimension_numbers = #tpu.dot_dimension_numbers<[1], [1], [0], [0], [0, 0, 1, 0], [], []>} : vector<32x32xbf16>, vector<128x32xbf16>, vector<32x128xf32> -> vector<32x128xf32>
    %c0_3 = arith.constant 0 : index
    %c0_4 = arith.constant 0 : index
    %4 = vector.load %arg3[%c0_3, %c0_4] : memref<32x1xf32, #tpu.memory_space<vmem>>, vector<32x1xf32>
    %5 = vector.broadcast %4 : vector<32x1xf32> to vector<32x128xf32>
    %6 = arith.addf %3, %5 : vector<32x128xf32>
    %cst_5 = arith.constant 0.000000e+00 : f32
    %7 = vector.broadcast %cst_5 : f32 to vector<32x128xf32>
    %8 = arith.maximumf %6, %7 : vector<32x128xf32>
    %9 = arith.truncf %8 : vector<32x128xf32> to vector<32x128xbf16>
    %c0_6 = arith.constant 0 : index
    %c0_7 = arith.constant 0 : index
    %10 = vector.load %arg4[%c0_6, %c0_7] : memref<32x32xbf16, #tpu.memory_space<vmem>>, vector<32x32xbf16>
    %cst_8 = arith.constant dense<0.000000e+00> : vector<32x128xf32>
    %11 = tpu.matmul %10, %9, %cst_8 {dimension_numbers = #tpu.dot_dimension_numbers<[1], [0], [0], [1], [0, 0, 1, 1], [], []>} : vector<32x32xbf16>, vector<32x128xbf16>, vector<32x128xf32> -> vector<32x128xf32>
    %c0_9 = arith.constant 0 : index
    %c0_10 = arith.constant 0 : index
    %12 = vector.load %arg5[%c0_9, %c0_10] : memref<32x1xf32, #tpu.memory_space<vmem>>, vector<32x1xf32>
    %13 = vector.broadcast %12 : vector<32x1xf32> to vector<32x128xf32>
    %14 = arith.addf %11, %13 : vector<32x128xf32>
    %cst_11 = arith.constant 0.000000e+00 : f32
    %15 = vector.broadcast %cst_11 : f32 to vector<32x128xf32>
    %16 = arith.maximumf %14, %15 : vector<32x128xf32>
    %17 = arith.truncf %16 : vector<32x128xf32> to vector<32x128xbf16>
    %c0_12 = arith.constant 0 : index
    %c0_13 = arith.constant 0 : index
    %18 = vector.load %arg6[%c0_12, %c0_13] : memref<16x32xbf16, #tpu.memory_space<vmem>>, vector<16x32xbf16>
    %cst_14 = arith.constant dense<0.000000e+00> : vector<16x128xf32>
    %19 = tpu.matmul %18, %17, %cst_14 {dimension_numbers = #tpu.dot_dimension_numbers<[1], [0], [0], [1], [0, 0, 1, 1], [], []>} : vector<16x32xbf16>, vector<32x128xbf16>, vector<16x128xf32> -> vector<16x128xf32>
    %c0_15 = arith.constant 0 : index
    %c0_16 = arith.constant 0 : index
    %20 = vector.load %arg7[%c0_15, %c0_16] : memref<16x1xf32, #tpu.memory_space<vmem>>, vector<16x1xf32>
    %21 = vector.broadcast %20 : vector<16x1xf32> to vector<16x128xf32>
    %22 = arith.addf %19, %21 : vector<16x128xf32>
    %cst_17 = arith.constant 0.000000e+00 : f32
    %23 = vector.broadcast %cst_17 : f32 to vector<16x128xf32>
    %24 = arith.maximumf %22, %23 : vector<16x128xf32>
    %25 = arith.truncf %24 : vector<16x128xf32> to vector<16x128xbf16>
    %c0_18 = arith.constant 0 : index
    %c0_19 = arith.constant 0 : index
    %26 = vector.load %arg8[%c0_18, %c0_19] : memref<2x16xbf16, #tpu.memory_space<vmem>>, vector<2x16xbf16>
    %cst_20 = arith.constant dense<0.000000e+00> : vector<2x128xf32>
    %27 = tpu.matmul %26, %25, %cst_20 {dimension_numbers = #tpu.dot_dimension_numbers<[1], [0], [0], [1], [0, 0, 1, 1], [], []>} : vector<2x16xbf16>, vector<16x128xbf16>, vector<2x128xf32> -> vector<2x128xf32>
    %c0_21 = arith.constant 0 : index
    %c0_22 = arith.constant 0 : index
    %28 = vector.load %arg9[%c0_21, %c0_22] : memref<2x1xf32, #tpu.memory_space<vmem>>, vector<2x1xf32>
    %29 = vector.broadcast %28 : vector<2x1xf32> to vector<2x128xf32>
    %30 = arith.addf %27, %29 : vector<2x128xf32>
    %cst_23 = arith.constant 0.000000e+00 : f32
    %31 = vector.broadcast %cst_23 : f32 to vector<2x128xf32>
    %32 = arith.maximumf %30, %31 : vector<2x128xf32>
    %cst_24 = arith.constant 0.000000e+00 : f32
    %33 = vector.broadcast %cst_24 : f32 to vector<2x128xf32>
    %34 = arith.subf %33, %32 : vector<2x128xf32>
    %35 = math.exp %34 : vector<2x128xf32>
    %cst_25 = arith.constant 1.000000e+00 : f32
    %36 = vector.broadcast %cst_25 : f32 to vector<2x128xf32>
    %37 = arith.addf %36, %35 : vector<2x128xf32>
    %cst_26 = arith.constant 1.000000e+00 : f32
    %38 = vector.broadcast %cst_26 : f32 to vector<2x128xf32>
    %39 = arith.divf %38, %37 : vector<2x128xf32>
    %c0_27 = arith.constant 0 : index
    %c0_28 = arith.constant 0 : index
    %40 = vector.load %arg10[%c0_27, %c0_28] : memref<2x128xf32, #tpu.memory_space<vmem>>, vector<2x128xf32>
    tpu.vector_store %arg10[%c0_27, %c0_28], %39 {strides = array<i32>} : memref<2x128xf32, #tpu.memory_space<vmem>>, vector<2x128xf32>,
    return
  }
  func.func @transform_0(%arg0: i32) -> (i32, i32) {
    %c0_i32 = arith.constant 0 : i32
    %c0_i32_0 = arith.constant 0 : i32
    return %arg0, %c0_i32 : i32, i32
  }
  func.func @transform_1(%arg0: i32) -> (i32, i32) {
    %c0_i32 = arith.constant 0 : i32
    %c0_i32_0 = arith.constant 0 : i32
    %c0_i32_1 = arith.constant 0 : i32
    return %c0_i32, %c0_i32_0 : i32, i32
  }
  func.func @transform_2(%arg0: i32) -> (i32, i32) {
    %c0_i32 = arith.constant 0 : i32
    %c0_i32_0 = arith.constant 0 : i32
    %c0_i32_1 = arith.constant 0 : i32
    return %c0_i32, %c0_i32_0 : i32, i32
  }
  func.func @transform_3(%arg0: i32) -> (i32, i32) {
    %c0_i32 = arith.constant 0 : i32
    %c0_i32_0 = arith.constant 0 : i32
    %c0_i32_1 = arith.constant 0 : i32
    return %c0_i32, %c0_i32_0 : i32, i32
  }
  func.func @transform_4(%arg0: i32) -> (i32, i32) {
    %c0_i32 = arith.constant 0 : i32
    %c0_i32_0 = arith.constant 0 : i32
    %c0_i32_1 = arith.constant 0 : i32
    return %c0_i32, %c0_i32_0 : i32, i32
  }
  func.func @transform_5(%arg0: i32) -> (i32, i32) {
    %c0_i32 = arith.constant 0 : i32
    %c0_i32_0 = arith.constant 0 : i32
    %c0_i32_1 = arith.constant 0 : i32
    return %c0_i32, %c0_i32_0 : i32, i32
  }
  func.func @transform_6(%arg0: i32) -> (i32, i32) {
    %c0_i32 = arith.constant 0 : i32
    %c0_i32_0 = arith.constant 0 : i32
    %c0_i32_1 = arith.constant 0 : i32
    return %c0_i32, %c0_i32_0 : i32, i32
  }
  func.func @transform_7(%arg0: i32) -> (i32, i32) {
    %c0_i32 = arith.constant 0 : i32
    %c0_i32_0 = arith.constant 0 : i32
    %c0_i32_1 = arith.constant 0 : i32
    return %c0_i32, %c0_i32_0 : i32, i32
  }
  func.func @transform_8(%arg0: i32) -> (i32, i32) {
    %c0_i32 = arith.constant 0 : i32
    %c0_i32_0 = arith.constant 0 : i32
    %c0_i32_1 = arith.constant 0 : i32
    return %c0_i32, %c0_i32_0 : i32, i32
  }
  func.func @transform_9(%arg0: i32) -> (i32, i32) {
    %c0_i32 = arith.constant 0 : i32
    %c0_i32_0 = arith.constant 0 : i32
    return %c0_i32, %arg0 : i32, i32
  }
}

</mosaic_0001>

<bundles_post_ra>
// kernel: tpu_custom_call.1
= control target key start
LH: loop header
LB: loop body
LE: loop exit
PB: predicated region body
PF: predicated region fallthrough
CT: control target
= control target key end

     0   :  { %vm96_vm0 = vcmask 261120   ;;  %v539_v5 = vmov 0   ;;  %s727_s0 = inlined_call_operand.vmem [shape: f32[128,32], index: 0, kind: input, shape index: {}]   ;;  %s728_s1 = inlined_call_operand.vmem [shape: bf16[32,32], index: 1, kind: input, shape index: {}]   ;;  %s729_s2 = inlined_call_operand.vmem [shape: f32[32,1], index: 2, kind: input, shape index: {}]   ;;  %s730_s3 = inlined_call_operand.vmem [shape: bf16[32,32], index: 3, kind: input, shape index: {}]   ;;  %s731_s4 = inlined_call_operand.vmem [shape: f32[32,1], index: 4, kind: input, shape index: {}]   ;;  %s732_s5 = inlined_call_operand.vmem [shape: bf16[16,32], index: 5, kind: input, shape index: {}]   ;;  %s733_s6 = inlined_call_operand.vmem [shape: f32[16,1], index: 6, kind: input, shape index: {}]   ;;  %s734_s7 = inlined_call_operand.vmem [shape: bf16[2,16], index: 7, kind: input, shape index: {}]   ;;  %s735_s8 = inlined_call_operand.vmem [shape: f32[2,1], index: 8, kind: input, shape index: {}]   ;;  %s736_s9 = inlined_call_operand.hbm [shape: f32[2,128], index: 9, kind: output, shape index: {}]  }
   0x1   :  { %v34_v0 = vld [vmem:[%s727_s0] sm:$0xff]  ;;  %v35_v1 = vld [vmem:[%s727_s0 + $0x8] sm:$0xff]  ;;  %v36_v2 = vld [vmem:[%s727_s0 + $0x10] sm:$0xff]  ;;  %504 = vset.pattern.permute.xlu0 %v539_v5  ;;  %505 = vset.pattern.permute.xlu1 %v539_v5 }
   0x2   :  { %v50_v3 = vpack.c.bf16 %v35_v1, %v34_v0  ;;  %v37_v4 = vld [vmem:[%s727_s0 + $0x18] sm:$0xff]  ;;  %v38_v8 = vld [vmem:[%s727_s0 + $0x20] sm:$0xff]  ;;  %v39_v9 = vld [vmem:[%s727_s0 + $0x28] sm:$0xff] }
   0x3   :  { %v51_v6 = vpack.c.bf16 %v37_v4, %v36_v2  ;;  %v506_v10 = vld [vmem:[%s728_s1] sm:$0xff]   ;;  %v64_v12 = vld [vmem:[%s729_s2 + $0x10] sm:$0xff]  ;;  %v52_v14 = vpack.c.bf16 %v39_v9, %v38_v8  ;;  %v63_v15 = vld [vmem:[%s729_s2 + $0x8] sm:$0xff] }
   0x4   :  { %492 = vmatprep.subr.msk.bf16.mxu0 %vm96_vm0, %v50_v3  ;;  %v104_v7 = vsel %vm96_vm0, %v50_v3, 0  ;;  %v62_v11 = vld [vmem:[%s729_s2] sm:$0xff]  ;;  %466 = vmatprep.mubr.msk.bf16.mxu0 %vm96_vm0, %v506_v10  ;;  %v65_v16 = vld [vmem:[%s729_s2 + $0x18] sm:$0xff] }
   0x5   :  { %451 = vmatpush3.bf16.xpose.msra.mxu0 %v104_v7  ;;  %68 = vperm.xlu0 %504, %v62_v11   ;;  %v107_v13 = vsel %vm96_vm0, %v51_v6, 0  ;;  %v186_v17 = vld [vmem:[%s731_s4] sm:$0xff] }
   0x6   :  { %493 = vmatprep.subr.msk.bf16.mxu0 %vm96_vm0, %v51_v6  ;;  %78 = vperm.xlu1 %505, %v64_v12  }
   0x9   :  { %73 = vperm.xlu0 %504, %v63_v15  }
   0xa   :  { %83 = vperm.xlu1 %505, %v65_v16  }
   0xd   :  { %453 = vmatpush3.bf16.xpose.msra.mxu0 %v107_v13 }
   0xe   :  { %494 = vmatprep.subr.msk.bf16.mxu0 %vm96_vm0, %v52_v14 }
   0xf   :  { %14 = vsyncpa [#allocation3], 0  ;;  %v40_v18 = vld [vmem:[%s727_s0 + $0x30] sm:$0xff]  ;;  %v41_v19 = vld [vmem:[%s727_s0 + $0x38] sm:$0xff]  ;;  %192 = vperm.xlu0 %504, %v186_v17   ;;  %v110_v21 = vsel %vm96_vm0, %v52_v14, 0  ;;  %v540_v2 = vmov 0.0  }
  0x10   :  { %v187_v20 = vld [vmem:[%s731_s4 + $0x8] sm:$0xff]  ;;  %v53_v22 = vpack.c.bf16 %v41_v19, %v40_v18  ;;  %v188_v23 = vld [vmem:[%s731_s4 + $0x10] sm:$0xff]  ;;  %v189_v24 = vld [vmem:[%s731_s4 + $0x18] sm:$0xff]  ;;  %vm541_vm1 = vmmov 0   ;;  %vm354_vm2 = vcmask 130048   ;;  %s542_s24 = smov [#allocation2]  }
  0x11   :  { %197 = vperm.xlu1 %505, %v187_v20   ;;  %v283_v25 = vld [vmem:[%s733_s6] sm:$0xff]  ;;  %v43_v27 = vld [vmem:[%s727_s0 + $0x48] sm:$0xff]  ;;  %v44_v32 = vld [vmem:[%s727_s0 + $0x50] sm:$0xff]  ;;  %s412_s25 = sshll.u32 %s542_s24, 4  ;;  %s413_s25 = int_to_ptr.vmem [resolvable:$true] %s412_s25 }
  0x12   :  { %v42_v26 = vld [vmem:[%s727_s0 + $0x40] sm:$0xff]  ;;  %v284_v28 = vld [vmem:[%s733_s6 + $0x8] sm:$0xff]  ;;  %v113_v29 = vsel %vm96_vm0, %v53_v22, 0  ;;  %v45_v33 = vld [vmem:[%s727_s0 + $0x58] sm:$0xff]  ;;  %p520_p1 = scmp.lt.s32.totalorder %s413_s25, %s413_s25 }
  0x13   :  { %202 = vperm.xlu0 %504, %v188_v23   ;;  %v54_v30 = vpack.c.bf16 %v43_v27, %v42_v26  ;;  %v348_v31 = vld [vmem:[%s735_s8] sm:$0x3]  ;;  %v55_v35 = vpack.c.bf16 %v45_v33, %v44_v32  ;;  %v47_v37 = vld [vmem:[%s727_s0 + $0x68] sm:$0xff]  ;;  %v48_v40 = vld [vmem:[%s727_s0 + $0x70] sm:$0xff] }
  0x14   :  { %v46_v36 = vld [vmem:[%s727_s0 + $0x60] sm:$0xff]  ;;  %v49_v41 = vld [vmem:[%s727_s0 + $0x78] sm:$0xff]  ;;  %v507_v45 = vld [vmem:[%s728_s1 + $0x8] sm:$0xff]  }
  0x15   :  { %455 = vmatpush3.bf16.xpose.msra.mxu0 %v110_v21  ;;  %207 = vperm.xlu1 %505, %v189_v24   ;;  %v116_v34 = vsel %vm96_vm0, %v54_v30, 0  ;;  %v119_v38 = vsel %vm96_vm0, %v55_v35, 0  ;;  %v56_v39 = vpack.c.bf16 %v47_v37, %v46_v36  ;;  %v57_v43 = vpack.c.bf16 %v49_v41, %v48_v40  ;;  %v508_v46 = vld [vmem:[%s730_s3] sm:$0xff]   ;;  %v509_v1 = vld [vmem:[%s730_s3 + $0x8] sm:$0xff]  }
  0x16   :  { %495 = vmatprep.subr.msk.bf16.mxu0 %vm96_vm0, %v53_v22  ;;  %474 = vmatprep.mubr.msk.bf16.mxu1 %vm96_vm0, %v508_v46  ;;  %v510_v21 = vld [vmem:[%s732_s5] sm:$0xff]  }
  0x17   :  { %287 = vperm.xlu0 %504, %v283_v25   ;;  %v122_v42 = vsel %vm96_vm0, %v56_v39, 0  ;;  %v125_v44 = vsel %vm96_vm0, %v57_v43, 0  ;;  %v347_v33 = vld [vmem:[%s734_s7] sm:$0x1]  ;;  %s515_s7 = scalar_lea.vmem %s413_s25, 32 }
  0x18   :  { %p516_p0 = scmp.ne.s32.totalorder %s413_s25, %s515_s7  ;;  %p521_p2 = scmp.lt.s32.totalorder %s515_s7, %s515_s7 }
  0x19   :  { %292 = vperm.xlu1 %505, %v284_v28  }
  0x1a   :  { %p522_p3 = por %p521_p2, %p520_p1 }
  0x1b   :  { %351 = vperm.xlu0 %504, %v348_v31  }
  0x1c   :  { %p523_p4 = pnand %p522_p3, %p516_p0 }
  0x1d   :  { %457 = vmatpush3.bf16.xpose.msra.mxu0 %v113_v29 }
  0x1e   :  { %496 = vmatprep.subr.msk.bf16.mxu0 %vm96_vm0, %v54_v30 }
  0x25   :  { %459 = vmatpush3.bf16.xpose.msra.mxu0 %v116_v34 }
  0x26   :  { %497 = vmatprep.subr.msk.bf16.mxu0 %vm96_vm0, %v55_v35 }
  0x2d   :  { %461 = vmatpush3.bf16.xpose.msra.mxu0 %v119_v38 }
  0x2e   :  { %498 = vmatprep.subr.msk.bf16.mxu0 %vm96_vm0, %v56_v39 }
  0x35   :  { %463 = vmatpush3.bf16.xpose.msra.mxu0 %v122_v42 }
  0x36   :  { %499 = vmatprep.subr.msk.bf16.mxu0 %vm96_vm0, %v57_v43 }
  0x3d   :  { %465 = vmatpush3.bf16.xpose.msra.mxu0 %v125_v44 }
  0x44   :  { %467 = vmatmul.mubr.msk.bf16.vlgmr.msra.gmra.mrb[0].mxu0 %vm96_vm0, %v507_v45 }
  0x84   :  { %v69_v48 = vpop.permute.xlu0 %68 }
  0x85   :  { %v79_v47 = vpop.permute.xlu1 %78 }
  0x88   :  { %v74_v55 = vpop.permute.xlu0 %73 }
  0x89   :  { %v84_v52 = vpop.permute.xlu1 %83 }
  0x8e   :  { %v193_v3 = vpop.permute.xlu0 %192 }
  0x90   :  { %v198_v4 = vpop.permute.xlu1 %197 }
  0x92   :  { %v203_v5 = vpop.permute.xlu0 %202 }
  0x94   :  { %v208_v9 = vpop.permute.xlu1 %207 }
  0x96   :  { %v288_v22 = vpop.permute.xlu0 %287 }
  0x98   :  { %v293_v26 = vpop.permute.xlu1 %292 }
  0x9a   :  { %v352_v34 = vpop.permute.xlu0 %351 }
 0x117   :  { %v468_v49 = vpop.f32.mrb[0].mxu0 }
 0x118   :  { %v170_v50 = vadd.f32 %v468_v49, %v79_v47  ;;  %v161_v51 = vpop.f32.mrb[1].mxu0 }
 0x119   :  { %v162_v53 = vadd.f32 %v161_v51, %v69_v48  ;;  %v469_v54 = vpop.f32.mrb[2].mxu0 }
 0x11a   :  { %v173_v56 = vadd.f32 %v469_v54, %v84_v52  ;;  %v164_v57 = vpop.f32.mrb[3].mxu0  ;;  %v178_v59 = vmax.f32 %v170_v50, 0.0 }
 0x11b   :  { %v165_v58 = vadd.f32 %v164_v57, %v74_v55  ;;  %v176_v61 = vmax.f32 %v162_v53, 0.0 }
 0x11c   :  { %v179_v60 = vmax.f32 %v173_v56, 0.0 }
 0x11d   :  { %v177_v62 = vmax.f32 %v165_v58, 0.0 }
 0x11e   :  { %v181_v63 = vpack.c.bf16 %v179_v60, %v178_v59 }
 0x11f   :  { %v180_v0 = vpack.c.bf16 %v177_v62, %v176_v61 }
 0x121   :  { %470 = vmatprep.subr.bf16.mxu1 %v180_v0 }
 0x122   :  { %471 = vmatpush3.bf16.msra.mxu1 %v180_v0 }
 0x123   :  { %472 = vmatprep.subr.bf16.mxu1 %v181_v63 }
 0x126   :  { %473 = vmatpush3.bf16.msra.mxu1 %v181_v63 }
 0x127   :  { %478 = vmatprep.subr.bf16.mxu1 %v540_v2 }
 0x129   :  { %475 = vmatmul.mubr.msk.bf16.vlgmr.msra.gmra.mrb[0].mxu1 %vm96_vm0, %v509_v1 }
 0x12a   :  { %482 = vmatprep.mubr.msk.bf16.mxu1 %vm541_vm1, %v540_v2 }
 0x1fc   :  { %v476_v6 = vpop.f32.mrb[0].mxu1 }
 0x1fd   :  { %v269_v7 = vadd.f32 %v476_v6, %v203_v5  ;;  %v260_v8 = vpop.f32.mrb[1].mxu1 }
 0x1fe   :  { %v261_v10 = vadd.f32 %v260_v8, %v193_v3  ;;  %v477_v11 = vpop.f32.mrb[2].mxu1 }
 0x1ff   :  { %v272_v12 = vadd.f32 %v477_v11, %v208_v9  ;;  %v263_v13 = vpop.f32.mrb[3].mxu1  ;;  %v277_v15 = vmax.f32 %v269_v7, 0.0 }
 0x200   :  { %v264_v14 = vadd.f32 %v263_v13, %v198_v4  ;;  %v275_v17 = vmax.f32 %v261_v10, 0.0 }
 0x201   :  { %v278_v16 = vmax.f32 %v272_v12, 0.0 }
 0x202   :  { %v276_v18 = vmax.f32 %v264_v14, 0.0 }
 0x203   :  { %v280_v19 = vpack.c.bf16 %v278_v16, %v277_v15 }
 0x204   :  { %v279_v20 = vpack.c.bf16 %v276_v18, %v275_v17 }
 0x206   :  { %479 = vmatpush3.bf16.msra.mxu1 %v279_v20 }
 0x207   :  { %480 = vmatprep.subr.bf16.mxu1 %v540_v2 }
 0x20a   :  { %481 = vmatpush3.bf16.msra.mxu1 %v280_v19 }
 0x20b   :  { %486 = vmatprep.subr.bf16.mxu1 %v540_v2 }
 0x20d   :  { %483 = vmatmul.mubr.msk.bf16.vlgmr.msra.gmra.mrb[4].mxu1 %vm96_vm0, %v510_v21 }
 0x20e   :  { %488 = vmatprep.mubr.msk.bf16.mxu1 %vm541_vm1, %v540_v2 }
 0x2e0   :  { %v337_v23 = vpop.f32.mrb[4].mxu1 }
 0x2e1   :  { %v338_v24 = vadd.f32 %v337_v23, %v288_v22  ;;  %v484_v25 = vpop.f32.mrb[5].mxu1 }
 0x2e2   :  { %v340_v27 = vpop.f32.mrb[6].mxu1 }
 0x2e3   :  { %v341_v28 = vadd.f32 %v340_v27, %v293_v26  ;;  %v485_v29 = vpop.f32.mrb[7].mxu1  ;;  %v344_v30 = vmax.f32 %v338_v24, 0.0 }
 0x2e5   :  { %v345_v31 = vmax.f32 %v341_v28, 0.0 }
 0x2e7   :  { %v346_v32 = vpack.c.bf16 %v345_v31, %v344_v30 }
 0x2e9   :  { %487 = vmatpush3.bf16.msra.mxu1 %v346_v32 }
 0x2ec   :  { %489 = vmatmul.mubr.msk.bf16.vlgmr.msra.gmra.mrb[8].mxu1 %vm354_vm2, %v347_v33 }
 0x3bf   :  { %v392_v35 = vpop.f32.mrb[8].mxu1 }
 0x3c0   :  { %v393_v36 = vadd.f32 %v392_v35, %v352_v34  ;;  %v490_v37 = vpop.f32.mrb[9].mxu1 }
 0x3c1   :  { %v395_v38 = vpop.f32.mrb[10].mxu1 }
 0x3c2   :  { %v398_v39 = vmax.f32 %v393_v36, 0.0  ;;  %v491_v40 = vpop.f32.mrb[11].mxu1 }
 0x3c4   :  { %v399_v41 = vsub.f32 0.0, %v398_v39 }
 0x3c6   :  { %v400_v42 = vmul.f32 1.442695, %v399_v41 }
 0x3c8   :  { %511 = vpow2.f32 %v400_v42 }
 0x3d2   :  { %v512_v43 = vpop.eup %511 }
 0x3d3   :  { %v402_v44 = vadd.f32 1.0, %v512_v43 }
 0x3d5   :  { %513 = vrcp.f32 %v402_v44 }
 0x3df   :  { %v514_v45 = vpop.eup %513 }
 0x3e0   :  { %405 = vst [vmem:[#allocation2] sm:$0x3] %v514_v45 }
 0x3e1   :  { %526 = shalt.err (!%p523_p4)
}
 0x3e2   :  { %s527_s28 = scalar_lea.hbm %s736_s9, 32 }
 0x3e3   :  { %p528_p5 = scmp.ne.s32.totalorder %s736_s9, %s527_s28  ;;  %p531_p6 = scmp.lt.u32.totalorder %s527_s28, %s736_s9 }
 0x3e5   :  { %p533_p7 = pnand %p531_p6, %p528_p5 }
 0x3e7   :  { %536 = shalt.err (!%p533_p7)
}
 0x3e8   :  { %415 = dma.vmem_to_hbm [thread:$0]  %s413_s25, 32, %s736_s9, [#allocation3]  }
 0x3e9   :  { %537 = dma.done.wait [#allocation3], 32  }
 0x3ea   :  { %538 = vsyncadd [#allocation3], 4294967264 }
 0x3eb   :  { %419 = vsyncpa [#allocation3], 1 }

</bundles_post_ra>
